<compile_context>
chip_gen: v7x
topology: tpu7x:2x2x1
jax: 0.10.0
libtpu: 0.0.40
codegen_flags: <defaults>
</compile_context>

<pallas_src>
import jax
import jax.numpy as jnp
from jax.experimental import pallas as pl
from jax.experimental.pallas import tpu as pltpu


def transfer_cell_kernel(src_ref, tgt_ref, wa_ref, wb_ref, b_ref, out_ref):
    src = src_ref[...]                                   # (tb, F) f32
    tgt = tgt_ref[...]                                   # (tb, F) f32
    F = src.shape[-1]
    # Fused [K1 | K2] projection of [src | tgt]: bf16 MXU matmuls, f32 accumulation.
    pre = (jnp.dot(src.astype(jnp.bfloat16), wa_ref[...],
                   preferred_element_type=jnp.float32)
           + jnp.dot(tgt.astype(jnp.bfloat16), wb_ref[...],
                     preferred_element_type=jnp.float32)
           + b_ref[...])                                 # (tb, 2F) f32
    gate = jax.nn.sigmoid(pre[:, :F])                    # sigmoid(K1(concat))
    cand = jnp.tanh(pre[:, F:])                          # tanh(K2(concat))
    out_ref[...] = (cand + gate * src).astype(out_ref.dtype)


def _choose_tb(B):
    # Largest MXU-friendly tile (<=512, multiple of 8) dividing B that still leaves
    # >=2 grid steps so the "parallel" axis can be sharded across TensorCores.
    for cand in (512, 256, 128, 64, 32, 16, 8):
        if B % cand == 0 and B // cand >= 2:
            return cand
    return B


def _build_call(B, F, tb, out_dtype, *, single_buffer_weights):
    wkw = {"pipeline_mode": pl.Buffered(1)} if single_buffer_weights else {}
    grid = (B // tb,)

    # Advisory cost hint for XLA scheduling around the custom call.
    flops = 2 * 2 * B * F * (2 * F)                      # two (B,F)@(F,2F) matmuls
    bytes_accessed = (2 * F * 2 * F * 2                  # wa + wb (bf16)
                      + 2 * F * 4                        # fused bias (f32)
                      + 3 * B * F * 4)                   # src + tgt + out (f32)
    transcendentals = 2 * B * F                          # sigmoid + tanh
    cost = pl.CostEstimate(flops=flops, transcendentals=transcendentals,
                           bytes_accessed=bytes_accessed)

    # Explicit VMEM budget: weight slab (x2 if double-buffered) + 2x (src,tgt,out)
    # tiles + headroom, clamped to [32 MiB default, 64 MiB = v7x physical].
    w_bytes = 2 * F * 2 * F * 2 + 2 * F * 4
    if not single_buffer_weights:
        w_bytes *= 2
    act_bytes = 2 * 3 * tb * F * 4
    vmem_limit = int(min(64 << 20, max(32 << 20, 2 * (w_bytes + act_bytes) + (8 << 20))))

    return pl.pallas_call(
        transfer_cell_kernel,
        out_shape=jax.ShapeDtypeStruct((B, F), out_dtype),
        grid_spec=pltpu.PrefetchScalarGridSpec(
            num_scalar_prefetch=0,
            grid=grid,
            in_specs=[
                pl.BlockSpec((tb, F), lambda i: (i, 0)),                     # src
                pl.BlockSpec((tb, F), lambda i: (i, 0)),                     # tgt
                pl.BlockSpec((F, 2 * F), lambda i: (0, 0), **wkw),           # wa
                pl.BlockSpec((F, 2 * F), lambda i: (0, 0), **wkw),           # wb
                pl.BlockSpec((1, 2 * F), lambda i: (0, 0), **wkw),           # bias
            ],
            out_specs=pl.BlockSpec((tb, F), lambda i: (i, 0)),
        ),
        compiler_params=pltpu.CompilerParams(
            dimension_semantics=("parallel",),
            vmem_limit_bytes=vmem_limit),
        cost_estimate=cost,
    )


def transfer_cell(src, tgt, params, *, tb=None):
    """src, tgt: (B, F) float32.  params: dict of packed weights (see init_params)."""
    B, F = src.shape
    assert F % 128 == 0, "feature axis must be a multiple of 128 (lane-dense)"
    # TODO(synk): pad the feature axis in the wrapper when F % 128 != 0.
    if tb is None:
        tb = _choose_tb(B)
    assert B % tb == 0
    args = (src, tgt, params["wa"], params["wb"], params["b"])
    try:
        return _build_call(B, F, tb, src.dtype, single_buffer_weights=True)(*args)
    except Exception:
        # Fallback for JAX builds where pipeline_mode=pl.Buffered(1) is not accepted
        # by the auto-pipeliner: default double-buffered weights (correct, more VMEM).
        return _build_call(B, F, tb, src.dtype, single_buffer_weights=False)(*args)


def init_params(key, feature_size, *, matmul_dtype=jnp.bfloat16):
    """Deterministic synthetic init matching nn.Linear(2F, F) x 2 (K1, K2).

    K1 and K2 are fused along the output axis; each (F, 2F) torch weight (out, in)
    is split into a source-half and a target-half (both transposed) so the kernel
    computes  src @ wa + tgt @ wb + b  with no in-kernel concat.
    """
    F = feature_size
    keys = jax.random.split(key, 4)
    bound = 1.0 / jnp.sqrt(2.0 * F)          # PyTorch Linear(2F, F) default bound
    cols_a, cols_b, bias_cols = [], [], []
    for j in range(2):                       # j=0 -> K1 (gate), j=1 -> K2 (candidate)
        kW, kb = keys[2 * j], keys[2 * j + 1]
        W = jax.random.uniform(kW, (F, 2 * F), jnp.float32,
                               minval=-bound, maxval=bound)   # torch layout (out, in)
        bias = jax.random.uniform(kb, (F,), jnp.float32,
                                  minval=-bound, maxval=bound)
        cols_a.append(W[:, :F].T)            # (F, F): multiplies source-half
        cols_b.append(W[:, F:].T)            # (F, F): multiplies target-half
        bias_cols.append(bias)
    wa_f32 = jnp.concatenate(cols_a, axis=1)              # (F, 2F) = [K1 | K2]
    wb_f32 = jnp.concatenate(cols_b, axis=1)
    b = jnp.concatenate(bias_cols, axis=0)                # (2F,)
    return {
        "wa": wa_f32.astype(matmul_dtype),                # (F, 2F) bf16 (kernel)
        "wb": wb_f32.astype(matmul_dtype),
        "b": b[None, :],                                  # (1, 2F) f32
        "wa_f32": wa_f32,                                 # f32 masters (reference)
        "wb_f32": wb_f32,
    }


def reference(src, tgt, params):
    """Pure-JAX f32 reference mirroring TransferCell.forward."""
    wa, wb, b = params["wa_f32"], params["wb_f32"], params["b"]
    F = src.shape[-1]
    pre = src @ wa + tgt @ wb + b
    return jnp.tanh(pre[:, F:]) + jax.nn.sigmoid(pre[:, :F]) * src


if __name__ == "__main__":
    B, F = 16, 128
    key = jax.random.PRNGKey(0)
    k_src, k_tgt, k_par = jax.random.split(key, 3)
    src = jax.random.normal(k_src, (B, F), jnp.float32)
    tgt = jax.random.normal(k_tgt, (B, F), jnp.float32)
    params = init_params(k_par, F)

    out = transfer_cell(src, tgt, params)
    out = jax.block_until_ready(out)

    ref = reference(src, tgt, params)
    assert out.shape == (B, F)
    # bf16 MXU operands (f32 accumulation) vs f32 reference -> loosened tolerance.
    max_diff = float(jnp.max(jnp.abs(out - ref)))
    assert jnp.allclose(out, ref, atol=2e-2, rtol=2e-2), (
        f"mismatch vs reference: max abs diff {max_diff}")
    print("KERNEL_OK")
</pallas_src>

<mosaic_0001>
module attributes {stable_mosaic.version = 11 : i64} {
  func.func @transfer_cell_kernel(%arg0: i32, %arg1: memref<8x128xf32, #tpu.memory_space<vmem>>, %arg2: memref<8x128xf32, #tpu.memory_space<vmem>>, %arg3: memref<128x256xbf16, #tpu.memory_space<vmem>>, %arg4: memref<128x256xbf16, #tpu.memory_space<vmem>>, %arg5: memref<1x256xf32, #tpu.memory_space<vmem>>, %arg6: memref<8x128xf32, #tpu.memory_space<vmem>>) attributes {dimension_semantics = [#tpu.dimension_semantics<parallel>], iteration_bounds = array<i64: 2>, scalar_prefetch = 0 : i64, scratch_operands = 0 : i64, tpu.core_type = #tpu.core_type<tc>, window_params = [{transform_indices = @transform_0, window_bounds = array<i64: 8, 128>}, {transform_indices = @transform_1, window_bounds = array<i64: 8, 128>}, {pipeline_mode = #tpu.pipeline_mode<synchronous>, transform_indices = @transform_2, window_bounds = array<i64: 128, 256>}, {pipeline_mode = #tpu.pipeline_mode<synchronous>, transform_indices = @transform_3, window_bounds = array<i64: 128, 256>}, {pipeline_mode = #tpu.pipeline_mode<synchronous>, transform_indices = @transform_4, window_bounds = array<i64: 1, 256>}, {transform_indices = @transform_5, window_bounds = array<i64: 8, 128>}]} {
    %c0 = arith.constant 0 : index
    %c0_0 = arith.constant 0 : index
    %0 = vector.load %arg1[%c0, %c0_0] : memref<8x128xf32, #tpu.memory_space<vmem>>, vector<8x128xf32>
    %c0_1 = arith.constant 0 : index
    %c0_2 = arith.constant 0 : index
    %1 = vector.load %arg2[%c0_1, %c0_2] : memref<8x128xf32, #tpu.memory_space<vmem>>, vector<8x128xf32>
    %2 = arith.truncf %0 : vector<8x128xf32> to vector<8x128xbf16>
    %c0_3 = arith.constant 0 : index
    %c0_4 = arith.constant 0 : index
    %3 = vector.load %arg3[%c0_3, %c0_4] : memref<128x256xbf16, #tpu.memory_space<vmem>>, vector<128x256xbf16>
    %cst = arith.constant dense<0.000000e+00> : vector<8x256xf32>
    %4 = tpu.matmul %2, %3, %cst {dimension_numbers = #tpu.dot_dimension_numbers<[1], [0], [0], [1], [0, 0, 1, 1], [], []>} : vector<8x128xbf16>, vector<128x256xbf16>, vector<8x256xf32> -> vector<8x256xf32>
    %5 = arith.truncf %1 : vector<8x128xf32> to vector<8x128xbf16>
    %c0_5 = arith.constant 0 : index
    %c0_6 = arith.constant 0 : index
    %6 = vector.load %arg4[%c0_5, %c0_6] : memref<128x256xbf16, #tpu.memory_space<vmem>>, vector<128x256xbf16>
    %cst_7 = arith.constant dense<0.000000e+00> : vector<8x256xf32>
    %7 = tpu.matmul %5, %6, %cst_7 {dimension_numbers = #tpu.dot_dimension_numbers<[1], [0], [0], [1], [0, 0, 1, 1], [], []>} : vector<8x128xbf16>, vector<128x256xbf16>, vector<8x256xf32> -> vector<8x256xf32>
    %8 = arith.addf %4, %7 : vector<8x256xf32>
    %c0_8 = arith.constant 0 : index
    %c0_9 = arith.constant 0 : index
    %9 = vector.load %arg5[%c0_8, %c0_9] : memref<1x256xf32, #tpu.memory_space<vmem>>, vector<1x256xf32>
    %10 = vector.broadcast %9 : vector<1x256xf32> to vector<8x256xf32>
    %11 = arith.addf %8, %10 : vector<8x256xf32>
    %12 = vector.extract_strided_slice %11 {offsets = [0, 0], sizes = [8, 128], strides = [1, 1]} : vector<8x256xf32> to vector<8x128xf32>
    %13 = arith.negf %12 : vector<8x128xf32>
    %14 = math.exp %13 : vector<8x128xf32>
    %cst_10 = arith.constant 1.000000e+00 : f32
    %15 = vector.broadcast %cst_10 : f32 to vector<8x128xf32>
    %16 = arith.addf %15, %14 : vector<8x128xf32>
    %17 = arith.divf %15, %16 : vector<8x128xf32>
    %18 = vector.extract_strided_slice %11 {offsets = [0, 128], sizes = [8, 128], strides = [1, 1]} : vector<8x256xf32> to vector<8x128xf32>
    %19 = math.tanh %18 : vector<8x128xf32>
    %20 = arith.mulf %17, %0 : vector<8x128xf32>
    %21 = arith.addf %19, %20 : vector<8x128xf32>
    %c0_11 = arith.constant 0 : index
    %c0_12 = arith.constant 0 : index
    %22 = vector.load %arg6[%c0_11, %c0_12] : memref<8x128xf32, #tpu.memory_space<vmem>>, vector<8x128xf32>
    tpu.vector_store %arg6[%c0_11, %c0_12], %21 {strides = array<i32>} : memref<8x128xf32, #tpu.memory_space<vmem>>, vector<8x128xf32>,
    return
  }
  func.func @transform_0(%arg0: i32) -> (i32, i32) {
    %c0_i32 = arith.constant 0 : i32
    %c0_i32_0 = arith.constant 0 : i32
    return %arg0, %c0_i32 : i32, i32
  }
  func.func @transform_1(%arg0: i32) -> (i32, i32) {
    %c0_i32 = arith.constant 0 : i32
    %c0_i32_0 = arith.constant 0 : i32
    return %arg0, %c0_i32 : i32, i32
  }
  func.func @transform_2(%arg0: i32) -> (i32, i32) {
    %c0_i32 = arith.constant 0 : i32
    %c0_i32_0 = arith.constant 0 : i32
    %c0_i32_1 = arith.constant 0 : i32
    return %c0_i32, %c0_i32_0 : i32, i32
  }
  func.func @transform_3(%arg0: i32) -> (i32, i32) {
    %c0_i32 = arith.constant 0 : i32
    %c0_i32_0 = arith.constant 0 : i32
    %c0_i32_1 = arith.constant 0 : i32
    return %c0_i32, %c0_i32_0 : i32, i32
  }
  func.func @transform_4(%arg0: i32) -> (i32, i32) {
    %c0_i32 = arith.constant 0 : i32
    %c0_i32_0 = arith.constant 0 : i32
    %c0_i32_1 = arith.constant 0 : i32
    return %c0_i32, %c0_i32_0 : i32, i32
  }
  func.func @transform_5(%arg0: i32) -> (i32, i32) {
    %c0_i32 = arith.constant 0 : i32
    %c0_i32_0 = arith.constant 0 : i32
    return %arg0, %c0_i32 : i32, i32
  }
}

module attributes {stable_mosaic.version = 11 : i64} {
  func.func @transfer_cell_kernel(%arg0: i32, %arg1: memref<8x128xf32, #tpu.memory_space<vmem>>, %arg2: memref<8x128xf32, #tpu.memory_space<vmem>>, %arg3: memref<128x256xbf16, #tpu.memory_space<vmem>>, %arg4: memref<128x256xbf16, #tpu.memory_space<vmem>>, %arg5: memref<1x256xf32, #tpu.memory_space<vmem>>, %arg6: memref<8x128xf32, #tpu.memory_space<vmem>>) attributes {dimension_semantics = [#tpu.dimension_semantics<parallel>], iteration_bounds = array<i64: 2>, scalar_prefetch = 0 : i64, scratch_operands = 0 : i64, tpu.core_type = #tpu.core_type<tc>, window_params = [{transform_indices = @transform_0, window_bounds = array<i64: 8, 128>}, {transform_indices = @transform_1, window_bounds = array<i64: 8, 128>}, {pipeline_mode = #tpu.pipeline_mode<synchronous>, transform_indices = @transform_2, window_bounds = array<i64: 128, 256>}, {pipeline_mode = #tpu.pipeline_mode<synchronous>, transform_indices = @transform_3, window_bounds = array<i64: 128, 256>}, {pipeline_mode = #tpu.pipeline_mode<synchronous>, transform_indices = @transform_4, window_bounds = array<i64: 1, 256>}, {transform_indices = @transform_5, window_bounds = array<i64: 8, 128>}]} {
    %c0 = arith.constant 0 : index
    %c0_0 = arith.constant 0 : index
    %0 = vector.load %arg1[%c0, %c0_0] : memref<8x128xf32, #tpu.memory_space<vmem>>, vector<8x128xf32>
    %c0_1 = arith.constant 0 : index
    %c0_2 = arith.constant 0 : index
    %1 = vector.load %arg2[%c0_1, %c0_2] : memref<8x128xf32, #tpu.memory_space<vmem>>, vector<8x128xf32>
    %2 = arith.truncf %0 : vector<8x128xf32> to vector<8x128xbf16>
    %c0_3 = arith.constant 0 : index
    %c0_4 = arith.constant 0 : index
    %3 = vector.load %arg3[%c0_3, %c0_4] : memref<128x256xbf16, #tpu.memory_space<vmem>>, vector<128x256xbf16>
    %cst = arith.constant dense<0.000000e+00> : vector<8x256xf32>
    %4 = tpu.matmul %2, %3, %cst {dimension_numbers = #tpu.dot_dimension_numbers<[1], [0], [0], [1], [0, 0, 1, 1], [], []>} : vector<8x128xbf16>, vector<128x256xbf16>, vector<8x256xf32> -> vector<8x256xf32>
    %5 = arith.truncf %1 : vector<8x128xf32> to vector<8x128xbf16>
    %c0_5 = arith.constant 0 : index
    %c0_6 = arith.constant 0 : index
    %6 = vector.load %arg4[%c0_5, %c0_6] : memref<128x256xbf16, #tpu.memory_space<vmem>>, vector<128x256xbf16>
    %cst_7 = arith.constant dense<0.000000e+00> : vector<8x256xf32>
    %7 = tpu.matmul %5, %6, %cst_7 {dimension_numbers = #tpu.dot_dimension_numbers<[1], [0], [0], [1], [0, 0, 1, 1], [], []>} : vector<8x128xbf16>, vector<128x256xbf16>, vector<8x256xf32> -> vector<8x256xf32>
    %8 = arith.addf %4, %7 : vector<8x256xf32>
    %c0_8 = arith.constant 0 : index
    %c0_9 = arith.constant 0 : index
    %9 = vector.load %arg5[%c0_8, %c0_9] : memref<1x256xf32, #tpu.memory_space<vmem>>, vector<1x256xf32>
    %10 = vector.broadcast %9 : vector<1x256xf32> to vector<8x256xf32>
    %11 = arith.addf %8, %10 : vector<8x256xf32>
    %12 = vector.extract_strided_slice %11 {offsets = [0, 0], sizes = [8, 128], strides = [1, 1]} : vector<8x256xf32> to vector<8x128xf32>
    %13 = arith.negf %12 : vector<8x128xf32>
    %14 = math.exp %13 : vector<8x128xf32>
    %cst_10 = arith.constant 1.000000e+00 : f32
    %15 = vector.broadcast %cst_10 : f32 to vector<8x128xf32>
    %16 = arith.addf %15, %14 : vector<8x128xf32>
    %17 = arith.divf %15, %16 : vector<8x128xf32>
    %18 = vector.extract_strided_slice %11 {offsets = [0, 128], sizes = [8, 128], strides = [1, 1]} : vector<8x256xf32> to vector<8x128xf32>
    %19 = math.tanh %18 : vector<8x128xf32>
    %20 = arith.mulf %17, %0 : vector<8x128xf32>
    %21 = arith.addf %19, %20 : vector<8x128xf32>
    %c0_11 = arith.constant 0 : index
    %c0_12 = arith.constant 0 : index
    %22 = vector.load %arg6[%c0_11, %c0_12] : memref<8x128xf32, #tpu.memory_space<vmem>>, vector<8x128xf32>
    tpu.vector_store %arg6[%c0_11, %c0_12], %21 {strides = array<i32>} : memref<8x128xf32, #tpu.memory_space<vmem>>, vector<8x128xf32>,
    return
  }
  func.func @transform_0(%arg0: i32) -> (i32, i32) {
    %c0_i32 = arith.constant 0 : i32
    %c0_i32_0 = arith.constant 0 : i32
    return %arg0, %c0_i32 : i32, i32
  }
  func.func @transform_1(%arg0: i32) -> (i32, i32) {
    %c0_i32 = arith.constant 0 : i32
    %c0_i32_0 = arith.constant 0 : i32
    return %arg0, %c0_i32 : i32, i32
  }
  func.func @transform_2(%arg0: i32) -> (i32, i32) {
    %c0_i32 = arith.constant 0 : i32
    %c0_i32_0 = arith.constant 0 : i32
    %c0_i32_1 = arith.constant 0 : i32
    return %c0_i32, %c0_i32_0 : i32, i32
  }
  func.func @transform_3(%arg0: i32) -> (i32, i32) {
    %c0_i32 = arith.constant 0 : i32
    %c0_i32_0 = arith.constant 0 : i32
    %c0_i32_1 = arith.constant 0 : i32
    return %c0_i32, %c0_i32_0 : i32, i32
  }
  func.func @transform_4(%arg0: i32) -> (i32, i32) {
    %c0_i32 = arith.constant 0 : i32
    %c0_i32_0 = arith.constant 0 : i32
    %c0_i32_1 = arith.constant 0 : i32
    return %c0_i32, %c0_i32_0 : i32, i32
  }
  func.func @transform_5(%arg0: i32) -> (i32, i32) {
    %c0_i32 = arith.constant 0 : i32
    %c0_i32_0 = arith.constant 0 : i32
    return %arg0, %c0_i32 : i32, i32
  }
}

</mosaic_0001>

<bundles_post_ra>
// kernel: tpu_custom_call.1
= control target key start
LH: loop header
LB: loop body
LE: loop exit
PB: predicated region body
PF: predicated region fallthrough
CT: control target
= control target key end

     0   :  { %s1431_s0 = inlined_call_operand.hbm [shape: f32[16,128], index: 0, kind: input, shape index: {}]   ;;  %s1432_s1 = inlined_call_operand.hbm [shape: f32[16,128], index: 1, kind: input, shape index: {}]   ;;  %s1433_s2 = inlined_call_operand.hbm [shape: bf16[128,256], index: 2, kind: input, shape index: {}]   ;;  %s1434_s3 = inlined_call_operand.hbm [shape: bf16[128,256], index: 3, kind: input, shape index: {}]   ;;  %s1435_s4 = inlined_call_operand.vmem [shape: f32[1,256], index: 4, kind: input, shape index: {}]   ;;  %s1436_s5 = inlined_call_operand.hbm [shape: f32[16,128], index: 5, kind: output, shape index: {}]  }
   0x1   :  { %1441 = sst [smem:[#allocation16_spill]] %s1433_s2 }
   0x2   :  { %1442 = sst [smem:[#allocation17_spill]] %s1434_s3 }
   0x3   :  { %10 = vsyncpa [#allocation3], 0 }
   0x4   :  { %12 = vsyncpa [#allocation3 + $0x1], 0 }
   0x5   :  { %13 = vsyncpa [#allocation6], 0 }
   0x6   :  { %15 = vsyncpa [#allocation6 + $0x1], 0 }
   0x7   :  { %16 = vsyncpa [#allocation9], 0 }
   0x8   :  { %17 = vsyncpa [#allocation4], 0 }
   0x9   :  { %19 = vsyncpa [#allocation4 + $0x1], 0  ;;  %s1150_s18 = smov 0   ;;  %s1152_s19 = smov 0  }
   0xa   :  { %s1154_s20 = smov 0   ;;  %s1156_s21 = smov 0  }
   0xb LB: > { %s1171_s22 = sadd.s32 4294967295, %s1110_s21   ;;  %s735_s23 = sadd.s32 4294967294, %s1110_s21   ;;  %s1110_s21 = sphi %s1156_s21, %s1464_s21   ;;  %s1106_s20 = sphi %s1154_s20, %s1463_s20   ;;  %s1102_s19 = sphi %s1152_s19, %s1462_s19   ;;  %s1098_s18 = sphi %s1150_s18, %s1461_s18  }
   0xc   : > { %p45_p0 = scmp.ne.s32.totalorder %s1102_s19, %s1098_s18  ;;  %p1437_p1 = scmp.eq.s32.totalorder %s1171_s22, 0 }
   0xd   : > { %p164_p3 = scmp.eq.s32.totalorder %s735_s23, 1  ;;  %p736_p5 = scmp.ge.s32.totalorder %s1110_s21, 1 }
   0xe   : > { %p1180_p4 = por %p1437_p1, %p45_p0  ;;  %p171_p7 = scmp.lt.s32.totalorder %s1110_s21, 3 }
   0xf   : > { %p1185_p6 = por %p164_p3, %p45_p0  ;;  %s1112_s27 = smov [#allocation7]  }
  0x10   : > { %s1443_s24 = scalar_select %p1180_p4, 1, 0 }
  0x11   : > { %s1444_s25 = scalar_select %p1185_p6, 1, 0 }
  0x12   : > { %p1190_p8 = pnand %p736_p5, %p171_p7  ;;  %s183_s28 = sshll.u32 %s1112_s27, 4  ;;  %s1194_s28 = int_to_ptr.vmem [resolvable:$true] %s183_s28 }
  0x13   : > { %s1113_s30 = smov [#allocation8]   ;;  %s1447_s2 = sld [smem:[#allocation16_spill]] }
  0x14   : > { %s1445_s26 = scalar_select %p1190_p8, 1, 0 }
  0x15   : > { %p801_p9 = pneg %p1190_p8  ;;  %s196_s6 = sshll.u32 %s1113_s30, 4  ;;  %s1205_s6 = int_to_ptr.vmem [resolvable:$true] %s196_s6 }
  0x17   : > { %p1201_p11 = pnand %p801_p9, %p1437_p1 }
  0x19   : > { %s916_s9 = scalar_lea.hbm %s1447_s2, 2048  ;;  %p918_p13 = pneg %p1201_p11 }
  0x1a   : > { %p917_p12 = scmp.ne.s32.totalorder %s1447_s2, %s916_s9  ;;  %p923_p5 = scmp.lt.u32.totalorder %s916_s9, %s1447_s2 }
  0x1c   : > { %p919_p0 = pnand %p918_p13, %p917_p12 }
  0x1e   : > { %p920_p3 = pneg %p919_p0 }
  0x20   : > { %p925_p7 = pnand %p923_p5, %p920_p3 }
  0x22   : > { %928 = shalt.err (!%p925_p7)
}
  0x23   : > { %s929_s14 = scalar_lea.vmem %s1194_s28, 2048  ;;  %p937_p2 = scmp.lt.s32.totalorder %s1194_s28, %s1194_s28 }
  0x24   : > { %p930_p9 = scmp.ne.s32.totalorder %s1194_s28, %s929_s14  ;;  %p938_p12 = scmp.lt.s32.totalorder %s929_s14, %s929_s14 }
  0x26   : > { %p932_p10 = pnand %p930_p9, %p918_p13  ;;  %p939_p0 = por %p938_p12, %p937_p2 }
  0x28   : > { %p933_p1 = pneg %p932_p10 }
  0x2a   : > { %p940_p6 = pnand %p939_p0, %p933_p1 }
  0x2c   : > { %943 = shalt.err (!%p940_p6)
}
  0x2d   : > { %s1114_s15 = smov 128   ;;  %s1115_s16 = smov 8  }
  0x2e   : > { %804 = dma.hbm_to_vmem [thread:$0]  (!%p1201_p11), %s1447_s2, 2048, %s1194_s28, [#allocation6], %s1114_s15, %s1114_s15, %s1115_s16  }
  0x2f   : > { %s1448_s3 = sld [smem:[#allocation17_spill]] }
  0x35   : > { %s944_s7 = scalar_lea.hbm %s1448_s3, 2048 }
  0x36   : > { %p945_p2 = scmp.ne.s32.totalorder %s1448_s3, %s944_s7  ;;  %p951_p10 = scmp.lt.u32.totalorder %s944_s7, %s1448_s3 }
  0x38   : > { %p947_p1 = pnand %p945_p2, %p918_p13 }
  0x3a   : > { %p948_p6 = pneg %p947_p1 }
  0x3c   : > { %p953_p3 = pnand %p951_p10, %p948_p6 }
  0x3e   : > { %956 = shalt.err (!%p953_p3)
}
  0x3f   : > { %s957_s28 = scalar_lea.vmem %s1205_s6, 2048  ;;  %p965_p12 = scmp.lt.s32.totalorder %s1205_s6, %s1205_s6 }
  0x40   : > { %p958_p5 = scmp.ne.s32.totalorder %s1205_s6, %s957_s28  ;;  %p966_p0 = scmp.lt.s32.totalorder %s957_s28, %s957_s28 }
  0x42   : > { %p960_p7 = pnand %p958_p5, %p918_p13  ;;  %p967_p2 = por %p966_p0, %p965_p12 }
  0x44   : > { %p961_p9 = pneg %p960_p7 }
  0x46   : > { %p968_p1 = pnand %p967_p2, %p961_p9 }
  0x48   : > { %971 = shalt.err (!%p968_p1)
}
  0x49   : > { %807 = dma.hbm_to_vmem [thread:$0]  (!%p1201_p11), %s1448_s3, 2048, %s1205_s6, [#allocation9], %s1114_s15, %s1114_s15, %s1115_s16  }
  0x4a   : > { %s1260_s14 = sadd.s32 1, %s1110_s21   ;;  %s32_s29 = sadd.s32 1, %s1106_s20 }
  0x4b   : > { %s29_s17 = ssub.s32 %s1110_s21, %s1260_s14  ;;  %p39_p13 = scmp.ne.s32.totalorder %s1106_s20, %s1102_s19 }
  0x4c   : > { %p30_p6 = scmp.eq.s32.totalorder %s29_s17, 0  ;;  %p40_p10 = scmp.eq.s32.totalorder %s1110_s21, 0 }
  0x4d   : > { %p1449_p3 = scmp.eq.s32.totalorder %s1171_s22, 1  ;;  %p821_p7 = scmp.lt.s32.totalorder %s1110_s21, 2 }
  0x4e   : > { %s1276_s27 = scalar_select %p30_p6, %s1106_s20, %s32_s29  }
  0x4f   : > { %p1270_p5 = por %p1449_p3, %p39_p13  ;;  %p41_p9 = por %p40_p10, %p39_p13 }
  0x50   : > { %s213_s30 = sand.u32 1, %s1106_s20   ;;  %s741_s15 = sshll.u32 %s1110_s21, 7 }
  0x51   : > { %s1450_s23 = scalar_select %p1270_p5, 1, 0 }
  0x52   : > { %s1279_s6 = sshll.u32 %s213_s30, 3  ;;  %s1285_s8 = scalar_lea.hbm %s1431_s0, %s741_s15 }
  0x53   : > { %s217_s9 = scalar_lea.vmem [#allocation2], %s1279_s6  ;;  %p1290_p11 = pnand %p821_p7, %p41_p9 }
  0x54   : > { %s224_s10 = sshll.u32 %s217_s9, 4  ;;  %s1297_s13 = scalar_lea.hbm %s1432_s1, %s741_s15  ;;  %s1288_s10 = int_to_ptr.vmem [resolvable:$true] %s224_s10 }
  0x55   : > { %s231_s29 = sand.u32 1, %s1110_s21   ;;  %s214_s17 = scalar_lea.sflag [#allocation3], %s213_s30 }
  0x56   : > { %s972_s16 = scalar_lea.hbm %s1285_s8, 128  ;;  %p974_p0 = pneg %p1290_p11 }
  0x57   : > { %p973_p12 = scmp.ne.s32.totalorder %s1285_s8, %s972_s16  ;;  %s977_s2 = scalar_lea.hbm %s1431_s0, 256 }
  0x58   : > { %p978_p13 = scmp.lt.u32.totalorder %s1285_s8, %s1431_s0  ;;  %p979_p6 = scmp.lt.u32.totalorder %s977_s2, %s972_s16 }
  0x59   : > { %p975_p2 = pnand %p974_p0, %p973_p12  ;;  %p981_p3 = scmp.lt.u32.totalorder %s972_s16, %s1285_s8 }
  0x5a   : > { %p980_p10 = por %p979_p6, %p978_p13 }
  0x5b   : > { %p976_p1 = pneg %p975_p2 }
  0x5c   : > { %p982_p7 = por %p981_p3, %p980_p10 }
  0x5e   : > { %p983_p9 = pnand %p982_p7, %p976_p1 }
  0x60   : > { %986 = shalt.err (!%p983_p9)
}
  0x61   : > { %s987_s30 = scalar_lea.vmem %s1288_s10, 128  ;;  %s1116_s15 = smov [#allocation2]  }
  0x62   : > { %p988_p12 = scmp.ne.s32.totalorder %s1288_s10, %s987_s30  ;;  %s992_s12 = sshll.u32 %s1116_s15, 4  ;;  %s993_s12 = int_to_ptr.vmem [resolvable:$false] %s992_s12 }
  0x63   : > { %s994_s3 = scalar_lea.vmem %s993_s12, 256  ;;  %p995_p4 = scmp.lt.s32.totalorder %s1288_s10, %s993_s12 }
  0x64   : > { %p990_p2 = pnand %p988_p12, %p974_p0  ;;  %p996_p13 = scmp.lt.s32.totalorder %s994_s3, %s987_s30 }
  0x66   : > { %p991_p5 = pneg %p990_p2  ;;  %p997_p6 = por %p996_p13, %p995_p4 }
  0x68   : > { %p998_p10 = pnand %p997_p6, %p991_p5 }
  0x6a   : > { %1001 = shalt.err (!%p998_p10)
}
  0x6b   : > { %811 = dma.hbm_to_vmem [thread:$0]  (!%p1290_p11), %s1285_s8, 128, %s1288_s10, %s214_s17  }
  0x6c   : > { %s235_s2 = scalar_lea.vmem [#allocation5], %s1279_s6  ;;  %s232_s7 = scalar_lea.sflag [#allocation6], %s231_s29 }
  0x6d   : > { %s242_s16 = sshll.u32 %s235_s2, 4  ;;  %s1002_s9 = scalar_lea.hbm %s1297_s13, 128  ;;  %s243_s16 = int_to_ptr.vmem [resolvable:$true] %s242_s16 }
  0x6e   : > { %p1003_p4 = scmp.ne.s32.totalorder %s1297_s13, %s1002_s9  ;;  %s1007_s15 = scalar_lea.hbm %s1432_s1, 256 }
  0x6f   : > { %p1008_p3 = scmp.lt.u32.totalorder %s1297_s13, %s1432_s1  ;;  %p1009_p7 = scmp.lt.u32.totalorder %s1007_s15, %s1002_s9 }
  0x70   : > { %p1005_p5 = pnand %p1003_p4, %p974_p0  ;;  %p1011_p12 = scmp.lt.u32.totalorder %s1002_s9, %s1297_s13 }
  0x71   : > { %p1010_p9 = por %p1009_p7, %p1008_p3 }
  0x72   : > { %p1006_p1 = pneg %p1005_p5 }
  0x73   : > { %p1012_p2 = por %p1011_p12, %p1010_p9 }
  0x75   : > { %p1013_p13 = pnand %p1012_p2, %p1006_p1 }
  0x77   : > { %1016 = shalt.err (!%p1013_p13)
}
  0x78   : > { %s1017_s6 = scalar_lea.vmem %s243_s16, 128  ;;  %s1117_s8 = smov [#allocation5]  }
  0x79   : > { %p1018_p6 = scmp.ne.s32.totalorder %s243_s16, %s1017_s6  ;;  %s1022_s10 = sshll.u32 %s1117_s8, 4  ;;  %s1023_s10 = int_to_ptr.vmem [resolvable:$false] %s1022_s10 }
  0x7a   : > { %s1024_s29 = scalar_lea.vmem %s1023_s10, 256  ;;  %p1025_p5 = scmp.lt.s32.totalorder %s243_s16, %s1023_s10 }
  0x7b   : > { %p1020_p10 = pnand %p1018_p6, %p974_p0  ;;  %p1026_p8 = scmp.lt.s32.totalorder %s1024_s29, %s1017_s6 }
  0x7d   : > { %p1021_p4 = pneg %p1020_p10  ;;  %p1027_p3 = por %p1026_p8, %p1025_p5 }
  0x7f   : > { %p1028_p7 = pnand %p1027_p3, %p1021_p4 }
  0x81   : > { %1031 = shalt.err (!%p1028_p7)
}
  0x82   : > { %814 = dma.hbm_to_vmem [thread:$0]  (!%p1290_p11), %s1297_s13, 128, %s243_s16, %s232_s7  }
  0x83   : > { %p1452_p1 = scmp.ne.s32.totalorder %s1445_s26, 0 }
  0x84   : > { %s1350_s17 = sand.u32 (!%p1452_p1), 1, %s1102_s19   ;;  %p1453_p8 = scmp.ne.s32.totalorder (!%p1452_p1), %s1443_s24, 0 }
  0x85   : > { %251 = sbr.rel (%p1452_p1) target bundleno = 445 (0x1bd), region = 40  ;;  %s1353_s2 = sshll.u32 (!%p1452_p1), %s1350_s17, 3 }
  0x86   : > { %s254_s9 = scalar_lea.sflag (!%p1452_p1), [#allocation3], %s1350_s17  ;;  %s257_s28 = scalar_lea.vmem (!%p1452_p1), [#allocation2], %s1353_s2 }
  0x8c   : > { %1077 = dma.done.wait (%p1453_p8), %s254_s9, 128  }
  0x8d   : > { %1079 = vsyncadd (%p1453_p8), %s254_s9, 4294967168  ;;  %s262_s26 = sand.u32 1, %s1171_s22   ;;  %s266_s13 = scalar_lea.vmem [#allocation5], %s1353_s2 }
  0x8e   : > { %s263_s11 = scalar_lea.sflag [#allocation6], %s262_s26 }
  0x8f   : > { %1081 = dma.done.wait (%p1453_p8), %s263_s11, 128  }
  0x90   : > { %1083 = vsyncadd (%p1453_p8), %s263_s11, 4294967168  ;;  %p1454_p11 = scmp.eq.s32.totalorder %s1171_s22, 0 }
  0x92   : > { %1085 = dma.done.wait (%p1454_p11), [#allocation6], 2048   ;;  %p1455_p0 = pmov %p1454_p11 }
  0x94   : > { %1087 = vsyncadd (%p1455_p0), [#allocation6], 4294965248  ;;  %p1456_p9 = pmov %p1455_p0 }
  0x95   : > { %p1457_p12 = pmov %p1455_p0 }
  0x96   : > { %1089 = dma.done.wait (%p1456_p9), [#allocation9], 2048  }
  0x97   : > { %1091 = vsyncadd (%p1457_p12), [#allocation9], 4294965248  ;;  %v1118_v0 = vmov 0   ;;  %v862_v1 = vld [vmem:[#allocation8 + $0x4] ss:$8 sps:$4 sm:$0xff]   ;;  %v308_v33 = vld [vmem:[%s266_s13] sm:$0xff]  ;;  %v587_v37 = vlaneseq }
  0x98   : > { %455 = vmatprep.mubr.bf16.mxu0 %v1118_v0  ;;  %576 = vmatprep.mubr.bf16.mxu1 %v1118_v0  ;;  %v864_v2 = vld [vmem:[#allocation7 + $0x4] ss:$8 sps:$4 sm:$0xff]   ;;  %v866_v3 = vld [vmem:[#allocation8] ss:$8 sps:$4 sm:$0xff]   ;;  %v868_v5 = vld [vmem:[#allocation8 + $0x14] ss:$8 sps:$4 sm:$0xff]   ;;  %v326_v35 = vpack.c.bf16 %v308_v33, %v308_v33 }
  0x99   : > { %423 = vmatprep.subr.bf16.mxu0 %v862_v1  ;;  %v867_v4 = vld [vmem:[#allocation7] ss:$8 sps:$4 sm:$0xff]   ;;  %544 = vmatprep.subr.bf16.mxu1 %v864_v2  ;;  %v870_v6 = vld [vmem:[#allocation7 + $0x14] ss:$8 sps:$4 sm:$0xff]   ;;  %v872_v7 = vld [vmem:[#allocation8 + $0x10] ss:$8 sps:$4 sm:$0xff]  }
  0x9a   : > { %424 = vmatpush1.bf16.msra.mxu0 %v866_v3  ;;  %545 = vmatpush1.bf16.msra.mxu1 %v867_v4  ;;  %v873_v8 = vld [vmem:[#allocation7 + $0x10] ss:$8 sps:$4 sm:$0xff]   ;;  %v874_v9 = vld [vmem:[#allocation8 + $0x24] ss:$8 sps:$4 sm:$0xff]   ;;  %v878_v11 = vld [vmem:[#allocation8 + $0x20] ss:$8 sps:$4 sm:$0xff]  }
  0x9b   : > { %425 = vmatprep.subr.bf16.mxu0 %v868_v5  ;;  %546 = vmatprep.subr.bf16.mxu1 %v870_v6  ;;  %v876_v10 = vld [vmem:[#allocation7 + $0x24] ss:$8 sps:$4 sm:$0xff]   ;;  %v879_v12 = vld [vmem:[#allocation7 + $0x20] ss:$8 sps:$4 sm:$0xff]   ;;  %v880_v13 = vld [vmem:[#allocation8 + $0x34] ss:$8 sps:$4 sm:$0xff]  }
  0x9c   : > { %v882_v14 = vld [vmem:[#allocation7 + $0x34] ss:$8 sps:$4 sm:$0xff]   ;;  %v884_v15 = vld [vmem:[#allocation8 + $0x30] ss:$8 sps:$4 sm:$0xff]   ;;  %v886_v17 = vld [vmem:[#allocation8 + $0x44] ss:$8 sps:$4 sm:$0xff]  }
  0x9d   : > { %v885_v16 = vld [vmem:[#allocation7 + $0x30] ss:$8 sps:$4 sm:$0xff]   ;;  %v888_v18 = vld [vmem:[#allocation7 + $0x44] ss:$8 sps:$4 sm:$0xff]   ;;  %v890_v19 = vld [vmem:[#allocation8 + $0x40] ss:$8 sps:$4 sm:$0xff]  }
  0x9e   : > { %426 = vmatpush1.bf16.msra.mxu0 %v872_v7  ;;  %547 = vmatpush1.bf16.msra.mxu1 %v873_v8  ;;  %v891_v20 = vld [vmem:[#allocation7 + $0x40] ss:$8 sps:$4 sm:$0xff]   ;;  %v892_v21 = vld [vmem:[#allocation8 + $0x54] ss:$8 sps:$4 sm:$0xff]   ;;  %v896_v23 = vld [vmem:[#allocation8 + $0x50] ss:$8 sps:$4 sm:$0xff]  }
  0x9f   : > { %427 = vmatprep.subr.bf16.mxu0 %v874_v9  ;;  %548 = vmatprep.subr.bf16.mxu1 %v876_v10  ;;  %v894_v22 = vld [vmem:[#allocation7 + $0x54] ss:$8 sps:$4 sm:$0xff]   ;;  %v897_v24 = vld [vmem:[#allocation7 + $0x50] ss:$8 sps:$4 sm:$0xff]   ;;  %v898_v25 = vld [vmem:[#allocation8 + $0x64] ss:$8 sps:$4 sm:$0xff]  }
  0xa0   : > { %v900_v26 = vld [vmem:[#allocation7 + $0x64] ss:$8 sps:$4 sm:$0xff]   ;;  %v902_v27 = vld [vmem:[#allocation8 + $0x60] ss:$8 sps:$4 sm:$0xff]   ;;  %v904_v29 = vld [vmem:[#allocation8 + $0x74] ss:$8 sps:$4 sm:$0xff]  }
  0xa1   : > { %v903_v28 = vld [vmem:[#allocation7 + $0x60] ss:$8 sps:$4 sm:$0xff]   ;;  %v906_v30 = vld [vmem:[#allocation7 + $0x74] ss:$8 sps:$4 sm:$0xff]   ;;  %v908_v31 = vld [vmem:[#allocation8 + $0x70] ss:$8 sps:$4 sm:$0xff]  }
  0xa2   : > { %428 = vmatpush1.bf16.msra.mxu0 %v878_v11  ;;  %549 = vmatpush1.bf16.msra.mxu1 %v879_v12  ;;  %v909_v32 = vld [vmem:[#allocation7 + $0x70] ss:$8 sps:$4 sm:$0xff]   ;;  %v307_v34 = vld [vmem:[%s257_s28] sm:$0xff]  ;;  %v588_v38 = vshrl.u32 %v587_v37, 7  ;;  %s784_s7 = sshll.u32 %s1171_s22, 7  ;;  %s305_s30 = scalar_lea.vmem [#allocation10], %s1353_s2 }
  0xa3   : > { %429 = vmatprep.subr.bf16.mxu0 %v880_v13  ;;  %550 = vmatprep.subr.bf16.mxu1 %v882_v14  ;;  %v309_v36 = vpack.c.bf16 %v307_v34, %v307_v34  ;;  %v585_v40 = vld [vmem:[%s1435_s4] sm:$0x3]  ;;  %s623_s15 = sshll.u32 %s305_s30, 4  ;;  %s1387_s6 = scalar_lea.hbm %s1436_s5, %s784_s7  ;;  %s1389_s15 = int_to_ptr.vmem [resolvable:$true] %s623_s15 }
  0xa4   : > { %v589_v39 = vsub.s32 0, %v588_v38  ;;  %v593_v54 = vsub.s32 1, %v588_v38  ;;  %s610_s8 = scalar_lea.sflag [#allocation4], %s1350_s17  ;;  %s1032_s10 = scalar_lea.vmem %s1389_s15, 128 }
  0xa5   : > { %p1033_p2 = scmp.ne.s32.totalorder %s1389_s15, %s1032_s10  ;;  %p1458_p13 = scmp.ne.s32.totalorder %s1450_s23, 0 }
  0xa6   : > { %430 = vmatpush1.bf16.msra.mxu0 %v884_v15  ;;  %551 = vmatpush1.bf16.msra.mxu1 %v885_v16  ;;  %v590_v41 = vrot.slane %v585_v40, %v589_v39  ;;  %v594_v55 = vrot.slane %v585_v40, %v593_v54  ;;  %s1119_s22 = smov [#allocation10]  }
  0xa7   : > { %431 = vmatprep.subr.bf16.mxu0 %v886_v17  ;;  %552 = vmatprep.subr.bf16.mxu1 %v888_v18  ;;  %p1034_p6 = pnand %p1033_p2, %p1458_p13  ;;  %s1036_s29 = sshll.u32 %s1119_s22, 4  ;;  %s1037_s29 = int_to_ptr.vmem [resolvable:$false] %s1036_s29 }
  0xa8   : > { %s1038_s2 = scalar_lea.vmem %s1037_s29, 256  ;;  %p1039_p4 = scmp.lt.s32.totalorder %s1389_s15, %s1037_s29 }
  0xa9   : > { %p1035_p10 = pneg %p1034_p6  ;;  %p1040_p5 = scmp.lt.s32.totalorder %s1038_s2, %s1032_s10 }
  0xaa   : > { %432 = vmatpush1.bf16.msra.mxu0 %v890_v19  ;;  %553 = vmatpush1.bf16.msra.mxu1 %v891_v20 }
  0xab   : > { %433 = vmatprep.subr.bf16.mxu0 %v892_v21  ;;  %554 = vmatprep.subr.bf16.mxu1 %v894_v22  ;;  %p1041_p3 = por %p1040_p5, %p1039_p4 }
  0xad   : > { %p1042_p7 = pnand %p1041_p3, %p1035_p10 }
  0xae   : > { %434 = vmatpush1.bf16.msra.mxu0 %v896_v23  ;;  %555 = vmatpush1.bf16.msra.mxu1 %v897_v24 }
  0xaf   : > { %435 = vmatprep.subr.bf16.mxu0 %v898_v25  ;;  %556 = vmatprep.subr.bf16.mxu1 %v900_v26 }
  0xb2   : > { %436 = vmatpush1.bf16.msra.mxu0 %v902_v27  ;;  %557 = vmatpush1.bf16.msra.mxu1 %v903_v28 }
  0xb3   : > { %437 = vmatprep.subr.bf16.mxu0 %v904_v29  ;;  %558 = vmatprep.subr.bf16.mxu1 %v906_v30 }
  0xb6   : > { %438 = vmatpush1.bf16.msra.mxu0 %v908_v31  ;;  %559 = vmatpush1.bf16.msra.mxu1 %v909_v32 }
  0xb9   : > { %456 = vmatmul.mubr.bf16.vlgmr.msra.gmra.mrb[0].mxu0 %v326_v35  ;;  %577 = vmatmul.mubr.bf16.vlgmr.msra.gmra.mrb[0].mxu1 %v309_v36 }
 0x18c   : > { %v457_v42 = vpop.f32.mrb[0].mxu0  ;;  %v578_v43 = vpop.f32.mrb[0].mxu1 }
 0x18d   : > { %v579_v44 = vadd.f32 %v578_v43, %v457_v42  ;;  %v459_v45 = vpop.f32.mrb[1].mxu0  ;;  %v580_v46 = vpop.f32.mrb[1].mxu1 }
 0x18e   : > { %v581_v47 = vadd.f32 %v580_v46, %v459_v45  ;;  %v461_v48 = vpop.f32.mrb[2].mxu0  ;;  %v582_v49 = vpop.f32.mrb[2].mxu1 }
 0x18f   : > { %v597_v50 = vadd.f32 %v590_v41, %v579_v44  ;;  %v462_v51 = vpop.f32.mrb[3].mxu0  ;;  %v583_v52 = vpop.f32.mrb[3].mxu1 }
 0x190   : > { %v598_v58 = vadd.f32 %v594_v55, %v581_v47 }
 0x191   : > { %v782_v53 = vmul.f32 -1.442695, %v597_v50 }
 0x193   : > { %910 = vpow2.f32 %v782_v53 }
 0x19d   : > { %v911_v56 = vpop.eup %910 }
 0x19e   : > { %v602_v57 = vadd.f32 1.0, %v911_v56 }
 0x1a0   : > { %912 = vrcp.f32 %v602_v57 }
 0x1a1   : > { %914 = vtanh.f32 %v598_v58 }
 0x1aa   : > { %v913_v59 = vpop.eup %912 }
 0x1ab   : > { %v606_v60 = vmul.f32 %v913_v59, %v307_v34  ;;  %v915_v61 = vpop.eup %914 }
 0x1ad   : > { %v607_v62 = vadd.f32 %v915_v61, %v606_v60 }
 0x1af   : > { %608 = vst [vmem:[%s305_s30] sm:$0xff] %v607_v62 }
 0x1b0   : > { %1045 = shalt.err (!%p1042_p7)
}
 0x1b1   : > { %s1046_s17 = scalar_lea.hbm %s1387_s6, 128  ;;  %s1050_s26 = scalar_lea.hbm %s1436_s5, 256 }
 0x1b2   : > { %p1047_p1 = scmp.ne.s32.totalorder %s1387_s6, %s1046_s17  ;;  %p1051_p0 = scmp.lt.u32.totalorder %s1387_s6, %s1436_s5 }
 0x1b3   : > { %p1052_p9 = scmp.lt.u32.totalorder %s1050_s26, %s1046_s17  ;;  %p1054_p2 = scmp.lt.u32.totalorder %s1046_s17, %s1387_s6 }
 0x1b4   : > { %p1048_p8 = pnand %p1047_p1, %p1458_p13 }
 0x1b5   : > { %p1053_p12 = por %p1052_p9, %p1051_p0 }
 0x1b6   : > { %p1049_p11 = pneg %p1048_p8 }
 0x1b7   : > { %p1055_p6 = por %p1054_p2, %p1053_p12 }
 0x1b9   : > { %p1056_p10 = pnand %p1055_p6, %p1049_p11 }
 0x1bb   : > { %1059 = shalt.err (!%p1056_p10)
}
 0x1bc   : > { %799 = dma.vmem_to_hbm [thread:$0]  (%p1458_p13), %s1389_s15, 128, %s1387_s6, %s610_s8  }
 0x1bd PF: > { %s635_s24 = sand.u32 1, %s1098_s18   ;;  %p1459_p4 = scmp.ne.s32.totalorder %s1444_s25, 0 }
 0x1be   : > { %p1460_p5 = scmp.ge.s32.totalorder %s1110_s21, 2  ;;  %s636_s16 = scalar_lea.sflag [#allocation4], %s635_s24 }
 0x1c0   : > { %p816_p3 = pnand %p1460_p5, %p1459_p4 }
 0x1c2   : > { %1093 = dma.done.wait (!%p816_p3), %s636_s16, 128  }
 0x1c3   : > { %1095 = vsyncadd (!%p816_p3), %s636_s16, 4294967168  ;;  %p22_p7 = scmp.ge.s32.totalorder %s1260_s14, 4   ;;  %s1461_s18 = smov %s1102_s19 }
 0x1c4   : > { %s1462_s19 = smov %s1106_s20  ;;  %s1463_s20 = smov %s1276_s27 }
 0x1c5   : > { %s1464_s21 = smov %s1260_s14  ;;  %24 = sbr.rel (!%p22_p7) target bundleno = 11 (0xb), region = 106 }
 0x1cc   :  { %641 = vsyncpa [#allocation3], 1 }
 0x1cd   :  { %643 = vsyncpa [#allocation3 + $0x1], 1 }
 0x1ce   :  { %644 = vsyncpa [#allocation6], 1 }
 0x1cf   :  { %646 = vsyncpa [#allocation6 + $0x1], 1 }
 0x1d0   :  { %647 = vsyncpa [#allocation9], 1 }
 0x1d1   :  { %648 = vsyncpa [#allocation4], 1 }
 0x1d2   :  { %650 = vsyncpa [#allocation4 + $0x1], 1 }

// kernel: tpu_custom_call.1
= control target key start
LH: loop header
LB: loop body
LE: loop exit
PB: predicated region body
PF: predicated region fallthrough
CT: control target
= control target key end

     0   :  { %s1431_s0 = inlined_call_operand.hbm [shape: f32[16,128], index: 0, kind: input, shape index: {}]   ;;  %s1432_s1 = inlined_call_operand.hbm [shape: f32[16,128], index: 1, kind: input, shape index: {}]   ;;  %s1433_s2 = inlined_call_operand.hbm [shape: bf16[128,256], index: 2, kind: input, shape index: {}]   ;;  %s1434_s3 = inlined_call_operand.hbm [shape: bf16[128,256], index: 3, kind: input, shape index: {}]   ;;  %s1435_s4 = inlined_call_operand.vmem [shape: f32[1,256], index: 4, kind: input, shape index: {}]   ;;  %s1436_s5 = inlined_call_operand.hbm [shape: f32[16,128], index: 5, kind: output, shape index: {}]  }
   0x1   :  { %1441 = sst [smem:[#allocation16_spill]] %s1433_s2 }
   0x2   :  { %1442 = sst [smem:[#allocation17_spill]] %s1434_s3 }
   0x3   :  { %10 = vsyncpa [#allocation3], 0 }
   0x4   :  { %12 = vsyncpa [#allocation3 + $0x1], 0 }
   0x5   :  { %13 = vsyncpa [#allocation6], 0 }
   0x6   :  { %15 = vsyncpa [#allocation6 + $0x1], 0 }
   0x7   :  { %16 = vsyncpa [#allocation9], 0 }
   0x8   :  { %17 = vsyncpa [#allocation4], 0 }
   0x9   :  { %19 = vsyncpa [#allocation4 + $0x1], 0  ;;  %s1150_s18 = smov 0   ;;  %s1152_s19 = smov 0  }
   0xa   :  { %s1154_s20 = smov 0   ;;  %s1156_s21 = smov 0  }
   0xb LB: > { %s1171_s22 = sadd.s32 4294967295, %s1110_s21   ;;  %s735_s23 = sadd.s32 4294967294, %s1110_s21   ;;  %s1110_s21 = sphi %s1156_s21, %s1464_s21   ;;  %s1106_s20 = sphi %s1154_s20, %s1463_s20   ;;  %s1102_s19 = sphi %s1152_s19, %s1462_s19   ;;  %s1098_s18 = sphi %s1150_s18, %s1461_s18  }
   0xc   : > { %p45_p0 = scmp.ne.s32.totalorder %s1102_s19, %s1098_s18  ;;  %p1437_p1 = scmp.eq.s32.totalorder %s1171_s22, 0 }
   0xd   : > { %p164_p3 = scmp.eq.s32.totalorder %s735_s23, 1  ;;  %p736_p5 = scmp.ge.s32.totalorder %s1110_s21, 1 }
   0xe   : > { %p1180_p4 = por %p1437_p1, %p45_p0  ;;  %p171_p7 = scmp.lt.s32.totalorder %s1110_s21, 3 }
   0xf   : > { %p1185_p6 = por %p164_p3, %p45_p0  ;;  %s1112_s27 = smov [#allocation7]  }
  0x10   : > { %s1443_s24 = scalar_select %p1180_p4, 1, 0 }
  0x11   : > { %s1444_s25 = scalar_select %p1185_p6, 1, 0 }
  0x12   : > { %p1190_p8 = pnand %p736_p5, %p171_p7  ;;  %s183_s28 = sshll.u32 %s1112_s27, 4  ;;  %s1194_s28 = int_to_ptr.vmem [resolvable:$true] %s183_s28 }
  0x13   : > { %s1113_s30 = smov [#allocation8]   ;;  %s1447_s2 = sld [smem:[#allocation16_spill]] }
  0x14   : > { %s1445_s26 = scalar_select %p1190_p8, 1, 0 }
  0x15   : > { %p801_p9 = pneg %p1190_p8  ;;  %s196_s6 = sshll.u32 %s1113_s30, 4  ;;  %s1205_s6 = int_to_ptr.vmem [resolvable:$true] %s196_s6 }
  0x17   : > { %p1201_p11 = pnand %p801_p9, %p1437_p1 }
  0x19   : > { %s916_s9 = scalar_lea.hbm %s1447_s2, 2048  ;;  %p918_p13 = pneg %p1201_p11 }
  0x1a   : > { %p917_p12 = scmp.ne.s32.totalorder %s1447_s2, %s916_s9  ;;  %p923_p5 = scmp.lt.u32.totalorder %s916_s9, %s1447_s2 }
  0x1c   : > { %p919_p0 = pnand %p918_p13, %p917_p12 }
  0x1e   : > { %p920_p3 = pneg %p919_p0 }
  0x20   : > { %p925_p7 = pnand %p923_p5, %p920_p3 }
  0x22   : > { %928 = shalt.err (!%p925_p7)
}
  0x23   : > { %s929_s14 = scalar_lea.vmem %s1194_s28, 2048  ;;  %p937_p2 = scmp.lt.s32.totalorder %s1194_s28, %s1194_s28 }
  0x24   : > { %p930_p9 = scmp.ne.s32.totalorder %s1194_s28, %s929_s14  ;;  %p938_p12 = scmp.lt.s32.totalorder %s929_s14, %s929_s14 }
  0x26   : > { %p932_p10 = pnand %p930_p9, %p918_p13  ;;  %p939_p0 = por %p938_p12, %p937_p2 }
  0x28   : > { %p933_p1 = pneg %p932_p10 }
  0x2a   : > { %p940_p6 = pnand %p939_p0, %p933_p1 }
  0x2c   : > { %943 = shalt.err (!%p940_p6)
}
  0x2d   : > { %s1114_s15 = smov 128   ;;  %s1115_s16 = smov 8  }
  0x2e   : > { %804 = dma.hbm_to_vmem [thread:$0]  (!%p1201_p11), %s1447_s2, 2048, %s1194_s28, [#allocation6], %s1114_s15, %s1114_s15, %s1115_s16  }
  0x2f   : > { %s1448_s3 = sld [smem:[#allocation17_spill]] }
  0x35   : > { %s944_s7 = scalar_lea.hbm %s1448_s3, 2048 }
  0x36   : > { %p945_p2 = scmp.ne.s32.totalorder %s1448_s3, %s944_s7  ;;  %p951_p10 = scmp.lt.u32.totalorder %s944_s7, %s1448_s3 }
  0x38   : > { %p947_p1 = pnand %p945_p2, %p918_p13 }
  0x3a   : > { %p948_p6 = pneg %p947_p1 }
  0x3c   : > { %p953_p3 = pnand %p951_p10, %p948_p6 }
  0x3e   : > { %956 = shalt.err (!%p953_p3)
}
  0x3f   : > { %s957_s28 = scalar_lea.vmem %s1205_s6, 2048  ;;  %p965_p12 = scmp.lt.s32.totalorder %s1205_s6, %s1205_s6 }
  0x40   : > { %p958_p5 = scmp.ne.s32.totalorder %s1205_s6, %s957_s28  ;;  %p966_p0 = scmp.lt.s32.totalorder %s957_s28, %s957_s28 }
  0x42   : > { %p960_p7 = pnand %p958_p5, %p918_p13  ;;  %p967_p2 = por %p966_p0, %p965_p12 }
  0x44   : > { %p961_p9 = pneg %p960_p7 }
  0x46   : > { %p968_p1 = pnand %p967_p2, %p961_p9 }
  0x48   : > { %971 = shalt.err (!%p968_p1)
}
  0x49   : > { %807 = dma.hbm_to_vmem [thread:$0]  (!%p1201_p11), %s1448_s3, 2048, %s1205_s6, [#allocation9], %s1114_s15, %s1114_s15, %s1115_s16  }
  0x4a   : > { %s1260_s14 = sadd.s32 1, %s1110_s21   ;;  %s32_s29 = sadd.s32 1, %s1106_s20 }
  0x4b   : > { %s29_s17 = ssub.s32 %s1110_s21, %s1260_s14  ;;  %p39_p13 = scmp.ne.s32.totalorder %s1106_s20, %s1102_s19 }
  0x4c   : > { %p30_p6 = scmp.eq.s32.totalorder %s29_s17, 0  ;;  %p40_p10 = scmp.eq.s32.totalorder %s1110_s21, 0 }
  0x4d   : > { %p1449_p3 = scmp.eq.s32.totalorder %s1171_s22, 1  ;;  %p821_p7 = scmp.lt.s32.totalorder %s1110_s21, 2 }
  0x4e   : > { %s1276_s27 = scalar_select %p30_p6, %s1106_s20, %s32_s29  }
  0x4f   : > { %p1270_p5 = por %p1449_p3, %p39_p13  ;;  %p41_p9 = por %p40_p10, %p39_p13 }
  0x50   : > { %s213_s30 = sand.u32 1, %s1106_s20   ;;  %s741_s15 = sshll.u32 %s1110_s21, 7 }
  0x51   : > { %s1450_s23 = scalar_select %p1270_p5, 1, 0 }
  0x52   : > { %s1279_s6 = sshll.u32 %s213_s30, 3  ;;  %s1285_s8 = scalar_lea.hbm %s1431_s0, %s741_s15 }
  0x53   : > { %s217_s9 = scalar_lea.vmem [#allocation2], %s1279_s6  ;;  %p1290_p11 = pnand %p821_p7, %p41_p9 }
  0x54   : > { %s224_s10 = sshll.u32 %s217_s9, 4  ;;  %s1297_s13 = scalar_lea.hbm %s1432_s1, %s741_s15  ;;  %s1288_s10 = int_to_ptr.vmem [resolvable:$true] %s224_s10 }
  0x55   : > { %s231_s29 = sand.u32 1, %s1110_s21   ;;  %s214_s17 = scalar_lea.sflag [#allocation3], %s213_s30 }
  0x56   : > { %s972_s16 = scalar_lea.hbm %s1285_s8, 128  ;;  %p974_p0 = pneg %p1290_p11 }
  0x57   : > { %p973_p12 = scmp.ne.s32.totalorder %s1285_s8, %s972_s16  ;;  %s977_s2 = scalar_lea.hbm %s1431_s0, 256 }
  0x58   : > { %p978_p13 = scmp.lt.u32.totalorder %s1285_s8, %s1431_s0  ;;  %p979_p6 = scmp.lt.u32.totalorder %s977_s2, %s972_s16 }
  0x59   : > { %p975_p2 = pnand %p974_p0, %p973_p12  ;;  %p981_p3 = scmp.lt.u32.totalorder %s972_s16, %s1285_s8 }
  0x5a   : > { %p980_p10 = por %p979_p6, %p978_p13 }
  0x5b   : > { %p976_p1 = pneg %p975_p2 }
  0x5c   : > { %p982_p7 = por %p981_p3, %p980_p10 }
  0x5e   : > { %p983_p9 = pnand %p982_p7, %p976_p1 }
  0x60   : > { %986 = shalt.err (!%p983_p9)
}
  0x61   : > { %s987_s30 = scalar_lea.vmem %s1288_s10, 128  ;;  %s1116_s15 = smov [#allocation2]  }
  0x62   : > { %p988_p12 = scmp.ne.s32.totalorder %s1288_s10, %s987_s30  ;;  %s992_s12 = sshll.u32 %s1116_s15, 4  ;;  %s993_s12 = int_to_ptr.vmem [resolvable:$false] %s992_s12 }
  0x63   : > { %s994_s3 = scalar_lea.vmem %s993_s12, 256  ;;  %p995_p4 = scmp.lt.s32.totalorder %s1288_s10, %s993_s12 }
  0x64   : > { %p990_p2 = pnand %p988_p12, %p974_p0  ;;  %p996_p13 = scmp.lt.s32.totalorder %s994_s3, %s987_s30 }
  0x66   : > { %p991_p5 = pneg %p990_p2  ;;  %p997_p6 = por %p996_p13, %p995_p4 }
  0x68   : > { %p998_p10 = pnand %p997_p6, %p991_p5 }
  0x6a   : > { %1001 = shalt.err (!%p998_p10)
}
  0x6b   : > { %811 = dma.hbm_to_vmem [thread:$0]  (!%p1290_p11), %s1285_s8, 128, %s1288_s10, %s214_s17  }
  0x6c   : > { %s235_s2 = scalar_lea.vmem [#allocation5], %s1279_s6  ;;  %s232_s7 = scalar_lea.sflag [#allocation6], %s231_s29 }
  0x6d   : > { %s242_s16 = sshll.u32 %s235_s2, 4  ;;  %s1002_s9 = scalar_lea.hbm %s1297_s13, 128  ;;  %s243_s16 = int_to_ptr.vmem [resolvable:$true] %s242_s16 }
  0x6e   : > { %p1003_p4 = scmp.ne.s32.totalorder %s1297_s13, %s1002_s9  ;;  %s1007_s15 = scalar_lea.hbm %s1432_s1, 256 }
  0x6f   : > { %p1008_p3 = scmp.lt.u32.totalorder %s1297_s13, %s1432_s1  ;;  %p1009_p7 = scmp.lt.u32.totalorder %s1007_s15, %s1002_s9 }
  0x70   : > { %p1005_p5 = pnand %p1003_p4, %p974_p0  ;;  %p1011_p12 = scmp.lt.u32.totalorder %s1002_s9, %s1297_s13 }
  0x71   : > { %p1010_p9 = por %p1009_p7, %p1008_p3 }
  0x72   : > { %p1006_p1 = pneg %p1005_p5 }
  0x73   : > { %p1012_p2 = por %p1011_p12, %p1010_p9 }
  0x75   : > { %p1013_p13 = pnand %p1012_p2, %p1006_p1 }
  0x77   : > { %1016 = shalt.err (!%p1013_p13)
}
  0x78   : > { %s1017_s6 = scalar_lea.vmem %s243_s16, 128  ;;  %s1117_s8 = smov [#allocation5]  }
  0x79   : > { %p1018_p6 = scmp.ne.s32.totalorder %s243_s16, %s1017_s6  ;;  %s1022_s10 = sshll.u32 %s1117_s8, 4  ;;  %s1023_s10 = int_to_ptr.vmem [resolvable:$false] %s1022_s10 }
  0x7a   : > { %s1024_s29 = scalar_lea.vmem %s1023_s10, 256  ;;  %p1025_p5 = scmp.lt.s32.totalorder %s243_s16, %s1023_s10 }
  0x7b   : > { %p1020_p10 = pnand %p1018_p6, %p974_p0  ;;  %p1026_p8 = scmp.lt.s32.totalorder %s1024_s29, %s1017_s6 }
  0x7d   : > { %p1021_p4 = pneg %p1020_p10  ;;  %p1027_p3 = por %p1026_p8, %p1025_p5 }
  0x7f   : > { %p1028_p7 = pnand %p1027_p3, %p1021_p4 }
  0x81   : > { %1031 = shalt.err (!%p1028_p7)
}
  0x82   : > { %814 = dma.hbm_to_vmem [thread:$0]  (!%p1290_p11), %s1297_s13, 128, %s243_s16, %s232_s7  }
  0x83   : > { %p1452_p1 = scmp.ne.s32.totalorder %s1445_s26, 0 }
  0x84   : > { %s1350_s17 = sand.u32 (!%p1452_p1), 1, %s1102_s19   ;;  %p1453_p8 = scmp.ne.s32.totalorder (!%p1452_p1), %s1443_s24, 0 }
  0x85   : > { %251 = sbr.rel (%p1452_p1) target bundleno = 445 (0x1bd), region = 40  ;;  %s1353_s2 = sshll.u32 (!%p1452_p1), %s1350_s17, 3 }
  0x86   : > { %s254_s9 = scalar_lea.sflag (!%p1452_p1), [#allocation3], %s1350_s17  ;;  %s257_s28 = scalar_lea.vmem (!%p1452_p1), [#allocation2], %s1353_s2 }
  0x8c   : > { %1077 = dma.done.wait (%p1453_p8), %s254_s9, 128  }
  0x8d   : > { %1079 = vsyncadd (%p1453_p8), %s254_s9, 4294967168  ;;  %s262_s26 = sand.u32 1, %s1171_s22   ;;  %s266_s13 = scalar_lea.vmem [#allocation5], %s1353_s2 }
  0x8e   : > { %s263_s11 = scalar_lea.sflag [#allocation6], %s262_s26 }
  0x8f   : > { %1081 = dma.done.wait (%p1453_p8), %s263_s11, 128  }
  0x90   : > { %1083 = vsyncadd (%p1453_p8), %s263_s11, 4294967168  ;;  %p1454_p11 = scmp.eq.s32.totalorder %s1171_s22, 0 }
  0x92   : > { %1085 = dma.done.wait (%p1454_p11), [#allocation6], 2048   ;;  %p1455_p0 = pmov %p1454_p11 }
  0x94   : > { %1087 = vsyncadd (%p1455_p0), [#allocation6], 4294965248  ;;  %p1456_p9 = pmov %p1455_p0 }
  0x95   : > { %p1457_p12 = pmov %p1455_p0 }
  0x96   : > { %1089 = dma.done.wait (%p1456_p9), [#allocation9], 2048  }
  0x97   : > { %1091 = vsyncadd (%p1457_p12), [#allocation9], 4294965248  ;;  %v1118_v0 = vmov 0   ;;  %v862_v1 = vld [vmem:[#allocation8 + $0x4] ss:$8 sps:$4 sm:$0xff]   ;;  %v308_v33 = vld [vmem:[%s266_s13] sm:$0xff]  ;;  %v587_v37 = vlaneseq }
  0x98   : > { %455 = vmatprep.mubr.bf16.mxu0 %v1118_v0  ;;  %576 = vmatprep.mubr.bf16.mxu1 %v1118_v0  ;;  %v864_v2 = vld [vmem:[#allocation7 + $0x4] ss:$8 sps:$4 sm:$0xff]   ;;  %v866_v3 = vld [vmem:[#allocation8] ss:$8 sps:$4 sm:$0xff]   ;;  %v868_v5 = vld [vmem:[#allocation8 + $0x14] ss:$8 sps:$4 sm:$0xff]   ;;  %v326_v35 = vpack.c.bf16 %v308_v33, %v308_v33 }
  0x99   : > { %423 = vmatprep.subr.bf16.mxu0 %v862_v1  ;;  %v867_v4 = vld [vmem:[#allocation7] ss:$8 sps:$4 sm:$0xff]   ;;  %544 = vmatprep.subr.bf16.mxu1 %v864_v2  ;;  %v870_v6 = vld [vmem:[#allocation7 + $0x14] ss:$8 sps:$4 sm:$0xff]   ;;  %v872_v7 = vld [vmem:[#allocation8 + $0x10] ss:$8 sps:$4 sm:$0xff]  }
  0x9a   : > { %424 = vmatpush1.bf16.msra.mxu0 %v866_v3  ;;  %545 = vmatpush1.bf16.msra.mxu1 %v867_v4  ;;  %v873_v8 = vld [vmem:[#allocation7 + $0x10] ss:$8 sps:$4 sm:$0xff]   ;;  %v874_v9 = vld [vmem:[#allocation8 + $0x24] ss:$8 sps:$4 sm:$0xff]   ;;  %v878_v11 = vld [vmem:[#allocation8 + $0x20] ss:$8 sps:$4 sm:$0xff]  }
  0x9b   : > { %425 = vmatprep.subr.bf16.mxu0 %v868_v5  ;;  %546 = vmatprep.subr.bf16.mxu1 %v870_v6  ;;  %v876_v10 = vld [vmem:[#allocation7 + $0x24] ss:$8 sps:$4 sm:$0xff]   ;;  %v879_v12 = vld [vmem:[#allocation7 + $0x20] ss:$8 sps:$4 sm:$0xff]   ;;  %v880_v13 = vld [vmem:[#allocation8 + $0x34] ss:$8 sps:$4 sm:$0xff]  }
  0x9c   : > { %v882_v14 = vld [vmem:[#allocation7 + $0x34] ss:$8 sps:$4 sm:$0xff]   ;;  %v884_v15 = vld [vmem:[#allocation8 + $0x30] ss:$8 sps:$4 sm:$0xff]   ;;  %v886_v17 = vld [vmem:[#allocation8 + $0x44] ss:$8 sps:$4 sm:$0xff]  }
  0x9d   : > { %v885_v16 = vld [vmem:[#allocation7 + $0x30] ss:$8 sps:$4 sm:$0xff]   ;;  %v888_v18 = vld [vmem:[#allocation7 + $0x44] ss:$8 sps:$4 sm:$0xff]   ;;  %v890_v19 = vld [vmem:[#allocation8 + $0x40] ss:$8 sps:$4 sm:$0xff]  }
  0x9e   : > { %426 = vmatpush1.bf16.msra.mxu0 %v872_v7  ;;  %547 = vmatpush1.bf16.msra.mxu1 %v873_v8  ;;  %v891_v20 = vld [vmem:[#allocation7 + $0x40] ss:$8 sps:$4 sm:$0xff]   ;;  %v892_v21 = vld [vmem:[#allocation8 + $0x54] ss:$8 sps:$4 sm:$0xff]   ;;  %v896_v23 = vld [vmem:[#allocation8 + $0x50] ss:$8 sps:$4 sm:$0xff]  }
  0x9f   : > { %427 = vmatprep.subr.bf16.mxu0 %v874_v9  ;;  %548 = vmatprep.subr.bf16.mxu1 %v876_v10  ;;  %v894_v22 = vld [vmem:[#allocation7 + $0x54] ss:$8 sps:$4 sm:$0xff]   ;;  %v897_v24 = vld [vmem:[#allocation7 + $0x50] ss:$8 sps:$4 sm:$0xff]   ;;  %v898_v25 = vld [vmem:[#allocation8 + $0x64] ss:$8 sps:$4 sm:$0xff]  }
  0xa0   : > { %v900_v26 = vld [vmem:[#allocation7 + $0x64] ss:$8 sps:$4 sm:$0xff]   ;;  %v902_v27 = vld [vmem:[#allocation8 + $0x60] ss:$8 sps:$4 sm:$0xff]   ;;  %v904_v29 = vld [vmem:[#allocation8 + $0x74] ss:$8 sps:$4 sm:$0xff]  }
  0xa1   : > { %v903_v28 = vld [vmem:[#allocation7 + $0x60] ss:$8 sps:$4 sm:$0xff]   ;;  %v906_v30 = vld [vmem:[#allocation7 + $0x74] ss:$8 sps:$4 sm:$0xff]   ;;  %v908_v31 = vld [vmem:[#allocation8 + $0x70] ss:$8 sps:$4 sm:$0xff]  }
  0xa2   : > { %428 = vmatpush1.bf16.msra.mxu0 %v878_v11  ;;  %549 = vmatpush1.bf16.msra.mxu1 %v879_v12  ;;  %v909_v32 = vld [vmem:[#allocation7 + $0x70] ss:$8 sps:$4 sm:$0xff]   ;;  %v307_v34 = vld [vmem:[%s257_s28] sm:$0xff]  ;;  %v588_v38 = vshrl.u32 %v587_v37, 7  ;;  %s784_s7 = sshll.u32 %s1171_s22, 7  ;;  %s305_s30 = scalar_lea.vmem [#allocation10], %s1353_s2 }
  0xa3   : > { %429 = vmatprep.subr.bf16.mxu0 %v880_v13  ;;  %550 = vmatprep.subr.bf16.mxu1 %v882_v14  ;;  %v309_v36 = vpack.c.bf16 %v307_v34, %v307_v34  ;;  %v585_v40 = vld [vmem:[%s1435_s4] sm:$0x3]  ;;  %s623_s15 = sshll.u32 %s305_s30, 4  ;;  %s1387_s6 = scalar_lea.hbm %s1436_s5, %s784_s7  ;;  %s1389_s15 = int_to_ptr.vmem [resolvable:$true] %s623_s15 }
  0xa4   : > { %v589_v39 = vsub.s32 0, %v588_v38  ;;  %v593_v54 = vsub.s32 1, %v588_v38  ;;  %s610_s8 = scalar_lea.sflag [#allocation4], %s1350_s17  ;;  %s1032_s10 = scalar_lea.vmem %s1389_s15, 128 }
  0xa5   : > { %p1033_p2 = scmp.ne.s32.totalorder %s1389_s15, %s1032_s10  ;;  %p1458_p13 = scmp.ne.s32.totalorder %s1450_s23, 0 }
  0xa6   : > { %430 = vmatpush1.bf16.msra.mxu0 %v884_v15  ;;  %551 = vmatpush1.bf16.msra.mxu1 %v885_v16  ;;  %v590_v41 = vrot.slane %v585_v40, %v589_v39  ;;  %v594_v55 = vrot.slane %v585_v40, %v593_v54  ;;  %s1119_s22 = smov [#allocation10]  }
  0xa7   : > { %431 = vmatprep.subr.bf16.mxu0 %v886_v17  ;;  %552 = vmatprep.subr.bf16.mxu1 %v888_v18  ;;  %p1034_p6 = pnand %p1033_p2, %p1458_p13  ;;  %s1036_s29 = sshll.u32 %s1119_s22, 4  ;;  %s1037_s29 = int_to_ptr.vmem [resolvable:$false] %s1036_s29 }
  0xa8   : > { %s1038_s2 = scalar_lea.vmem %s1037_s29, 256  ;;  %p1039_p4 = scmp.lt.s32.totalorder %s1389_s15, %s1037_s29 }
  0xa9   : > { %p1035_p10 = pneg %p1034_p6  ;;  %p1040_p5 = scmp.lt.s32.totalorder %s1038_s2, %s1032_s10 }
  0xaa   : > { %432 = vmatpush1.bf16.msra.mxu0 %v890_v19  ;;  %553 = vmatpush1.bf16.msra.mxu1 %v891_v20 }
  0xab   : > { %433 = vmatprep.subr.bf16.mxu0 %v892_v21  ;;  %554 = vmatprep.subr.bf16.mxu1 %v894_v22  ;;  %p1041_p3 = por %p1040_p5, %p1039_p4 }
  0xad   : > { %p1042_p7 = pnand %p1041_p3, %p1035_p10 }
  0xae   : > { %434 = vmatpush1.bf16.msra.mxu0 %v896_v23  ;;  %555 = vmatpush1.bf16.msra.mxu1 %v897_v24 }
  0xaf   : > { %435 = vmatprep.subr.bf16.mxu0 %v898_v25  ;;  %556 = vmatprep.subr.bf16.mxu1 %v900_v26 }
  0xb2   : > { %436 = vmatpush1.bf16.msra.mxu0 %v902_v27  ;;  %557 = vmatpush1.bf16.msra.mxu1 %v903_v28 }
  0xb3   : > { %437 = vmatprep.subr.bf16.mxu0 %v904_v29  ;;  %558 = vmatprep.subr.bf16.mxu1 %v906_v30 }
  0xb6   : > { %438 = vmatpush1.bf16.msra.mxu0 %v908_v31  ;;  %559 = vmatpush1.bf16.msra.mxu1 %v909_v32 }
  0xb9   : > { %456 = vmatmul.mubr.bf16.vlgmr.msra.gmra.mrb[0].mxu0 %v326_v35  ;;  %577 = vmatmul.mubr.bf16.vlgmr.msra.gmra.mrb[0].mxu1 %v309_v36 }
 0x18c   : > { %v457_v42 = vpop.f32.mrb[0].mxu0  ;;  %v578_v43 = vpop.f32.mrb[0].mxu1 }
 0x18d   : > { %v579_v44 = vadd.f32 %v578_v43, %v457_v42  ;;  %v459_v45 = vpop.f32.mrb[1].mxu0  ;;  %v580_v46 = vpop.f32.mrb[1].mxu1 }
 0x18e   : > { %v581_v47 = vadd.f32 %v580_v46, %v459_v45  ;;  %v461_v48 = vpop.f32.mrb[2].mxu0  ;;  %v582_v49 = vpop.f32.mrb[2].mxu1 }
 0x18f   : > { %v597_v50 = vadd.f32 %v590_v41, %v579_v44  ;;  %v462_v51 = vpop.f32.mrb[3].mxu0  ;;  %v583_v52 = vpop.f32.mrb[3].mxu1 }
 0x190   : > { %v598_v58 = vadd.f32 %v594_v55, %v581_v47 }
 0x191   : > { %v782_v53 = vmul.f32 -1.442695, %v597_v50 }
 0x193   : > { %910 = vpow2.f32 %v782_v53 }
 0x19d   : > { %v911_v56 = vpop.eup %910 }
 0x19e   : > { %v602_v57 = vadd.f32 1.0, %v911_v56 }
 0x1a0   : > { %912 = vrcp.f32 %v602_v57 }
 0x1a1   : > { %914 = vtanh.f32 %v598_v58 }
 0x1aa   : > { %v913_v59 = vpop.eup %912 }
 0x1ab   : > { %v606_v60 = vmul.f32 %v913_v59, %v307_v34  ;;  %v915_v61 = vpop.eup %914 }
 0x1ad   : > { %v607_v62 = vadd.f32 %v915_v61, %v606_v60 }
 0x1af   : > { %608 = vst [vmem:[%s305_s30] sm:$0xff] %v607_v62 }
 0x1b0   : > { %1045 = shalt.err (!%p1042_p7)
}
 0x1b1   : > { %s1046_s17 = scalar_lea.hbm %s1387_s6, 128  ;;  %s1050_s26 = scalar_lea.hbm %s1436_s5, 256 }
 0x1b2   : > { %p1047_p1 = scmp.ne.s32.totalorder %s1387_s6, %s1046_s17  ;;  %p1051_p0 = scmp.lt.u32.totalorder %s1387_s6, %s1436_s5 }
 0x1b3   : > { %p1052_p9 = scmp.lt.u32.totalorder %s1050_s26, %s1046_s17  ;;  %p1054_p2 = scmp.lt.u32.totalorder %s1046_s17, %s1387_s6 }
 0x1b4   : > { %p1048_p8 = pnand %p1047_p1, %p1458_p13 }
 0x1b5   : > { %p1053_p12 = por %p1052_p9, %p1051_p0 }
 0x1b6   : > { %p1049_p11 = pneg %p1048_p8 }
 0x1b7   : > { %p1055_p6 = por %p1054_p2, %p1053_p12 }
 0x1b9   : > { %p1056_p10 = pnand %p1055_p6, %p1049_p11 }
 0x1bb   : > { %1059 = shalt.err (!%p1056_p10)
}
 0x1bc   : > { %799 = dma.vmem_to_hbm [thread:$0]  (%p1458_p13), %s1389_s15, 128, %s1387_s6, %s610_s8  }
 0x1bd PF: > { %s635_s24 = sand.u32 1, %s1098_s18   ;;  %p1459_p4 = scmp.ne.s32.totalorder %s1444_s25, 0 }
 0x1be   : > { %p1460_p5 = scmp.ge.s32.totalorder %s1110_s21, 2  ;;  %s636_s16 = scalar_lea.sflag [#allocation4], %s635_s24 }
 0x1c0   : > { %p816_p3 = pnand %p1460_p5, %p1459_p4 }
 0x1c2   : > { %1093 = dma.done.wait (!%p816_p3), %s636_s16, 128  }
 0x1c3   : > { %1095 = vsyncadd (!%p816_p3), %s636_s16, 4294967168  ;;  %p22_p7 = scmp.ge.s32.totalorder %s1260_s14, 4   ;;  %s1461_s18 = smov %s1102_s19 }
 0x1c4   : > { %s1462_s19 = smov %s1106_s20  ;;  %s1463_s20 = smov %s1276_s27 }
 0x1c5   : > { %s1464_s21 = smov %s1260_s14  ;;  %24 = sbr.rel (!%p22_p7) target bundleno = 11 (0xb), region = 106 }
 0x1cc   :  { %641 = vsyncpa [#allocation3], 1 }
 0x1cd   :  { %643 = vsyncpa [#allocation3 + $0x1], 1 }
 0x1ce   :  { %644 = vsyncpa [#allocation6], 1 }
 0x1cf   :  { %646 = vsyncpa [#allocation6 + $0x1], 1 }
 0x1d0   :  { %647 = vsyncpa [#allocation9], 1 }
 0x1d1   :  { %648 = vsyncpa [#allocation4], 1 }
 0x1d2   :  { %650 = vsyncpa [#allocation4 + $0x1], 1 }

</bundles_post_ra>
